<compile_context>
chip_gen: v6e
topology: v6e:2x2x1
jax: 0.10.0
libtpu: 0.0.40
codegen_flags: <defaults>
</compile_context>

<pallas_src>
import functools

import jax
import jax.numpy as jnp
from jax.scipy.linalg import block_diag
from jax.experimental import pallas as pl
from jax.experimental.pallas import tpu as pltpu


# ----------------------------- fused Pallas kernel ---------------------------

def _student_kernel(x_ref, w_in_ref, b_in_ref, w_main_ref, b_main_ref,
                    w_cls_ref, b_cls_ref, o_ref, acc_ref, *, nb, inv_s):
    """One (sample-block, location-tile) grid step of the Student forward.

    Feature-major compute space: the M*T*V location axis is lane-dense.

    x_ref:      (nb, I*C, ts)    locations of nb samples, channels on sublanes
    w_in_ref:   (I*H, I*C)       block-diag input-stream weights^T (== concat)
    w_main_ref: (Cm, I*H)        main-stream 1x1 conv weight^T
    w_cls_ref:  (num_class, Cm)  classifier Linear weight^T
    acc_ref:    (Cm, nb)         running per-sample sum over all M*T*V locations
    o_ref:      (nb, num_class, 1)
    """
    s_idx = pl.program_id(1)

    @pl.when(s_idx == 0)
    def _():
        acc_ref[...] = jnp.zeros_like(acc_ref)

    for b in range(nb):                    # static unroll over folded samples
        xb = x_ref[b]                                            # (I*C, ts)
        # Input streams (J,V,B,A) as one block-diagonal matmul + bias + ReLU.
        h = jnp.dot(w_in_ref[...], xb, preferred_element_type=jnp.float32)
        h = jnp.maximum(h + b_in_ref[...], 0.0)                  # (I*H, ts) f32
        h = h.astype(w_main_ref.dtype)
        # Main stream 1x1 conv + bias + ReLU.
        m = jnp.dot(w_main_ref[...], h, preferred_element_type=jnp.float32)
        m = jnp.maximum(m + b_main_ref[...], 0.0)                # (Cm, ts) f32
        # Global-average-pool partial sum: lane reduce (XLU slot, off the
        # load/VPU critical path).
        acc_ref[:, b:b + 1] += jnp.sum(m, axis=1, keepdims=True)

    @pl.when(s_idx == pl.num_programs(1) - 1)
    def _():
        pooled = (acc_ref[...] * inv_s).astype(w_cls_ref.dtype)  # (Cm, nb)
        logits = (jnp.dot(w_cls_ref[...], pooled,
                          preferred_element_type=jnp.float32)
                  + b_cls_ref[...])                              # (nc, nb) f32
        for b in range(nb):        # tiny (num_class, 1) store per sample
            o_ref[b] = logits[:, b:b + 1]


def _pick_tiles(n, s, cin, itemsize, tile_budget):
    """Pick (nb: samples folded per grid step, ts: location-tile size)."""
    # Location tile: whole sample when it fits the per-buffer budget, otherwise
    # the largest 128-aligned power-of-two divisor that does (lane alignment).
    ts = s
    if s % 128 == 0:
        while ts * cin * itemsize > tile_budget and ts % 256 == 0:
            ts //= 2
    # Fold whole samples per step to amortize the ~0.35 us/step grid overhead,
    # keeping >= 2 sample blocks on the "parallel" axis (v7x: 2 TensorCores)
    # and the double-buffered x tile within budget.
    nb = 1
    if ts == s:
        while (n % (2 * nb) == 0 and n // (2 * nb) >= 2
               and 2 * nb * s * cin * itemsize <= tile_budget):
            nb *= 2
    return nb, ts


def _fused_forward(x_f, w_in_t, b_in, w_main_t, b_main, w_cls_t, b_cls,
                   tile_budget):
    """x_f: (N, I*C, S=T*V*M) -> logits (N, num_class)."""
    n, cin, s = x_f.shape
    hcat = w_in_t.shape[0]
    cm = w_main_t.shape[0]
    nc = w_cls_t.shape[0]
    nb, ts = _pick_tiles(n, s, cin, x_f.dtype.itemsize, tile_budget)
    n_s = s // ts

    kernel = functools.partial(_student_kernel, nb=nb, inv_s=1.0 / s)
    out = pl.pallas_call(
        kernel,
        out_shape=jax.ShapeDtypeStruct((n, nc, 1), jnp.float32),
        grid_spec=pltpu.PrefetchScalarGridSpec(
            num_scalar_prefetch=0,
            grid=(n // nb, n_s),
            in_specs=[
                pl.BlockSpec((nb, cin, ts), lambda i, j: (i, 0, j)),
                # Weights / biases stay resident in VMEM (constant index_map).
                pl.BlockSpec((hcat, cin), lambda i, j: (0, 0)),
                pl.BlockSpec((hcat, 1), lambda i, j: (0, 0)),
                pl.BlockSpec((cm, hcat), lambda i, j: (0, 0)),
                pl.BlockSpec((cm, 1), lambda i, j: (0, 0)),
                pl.BlockSpec((nc, cm), lambda i, j: (0, 0)),
                pl.BlockSpec((nc, 1), lambda i, j: (0, 0)),
            ],
            out_specs=pl.BlockSpec((nb, nc, 1), lambda i, j: (i, 0, 0)),
            scratch_shapes=[pltpu.VMEM((cm, nb), jnp.float32)],
        ),
        compiler_params=pltpu.CompilerParams(
            # Sample blocks shard across TCs; location tiles accumulate in VMEM.
            dimension_semantics=("parallel", "arbitrary"),
            # Explicit scoped-VMEM cap that is safe on v5e/v6e/v7x and well
            # above the <= ~8 MiB of double-buffered tiles chosen above.
            vmem_limit_bytes=32 * 1024 * 1024),
    )(x_f, w_in_t, b_in, w_main_t, b_main, w_cls_t, b_cls)
    return out.reshape(n, nc)


# ------------------------------ Student forward ------------------------------

def student_forward(x, params, *, tile_budget=4 << 20):
    """x: (N, I, C, T, V, M). Returns (N, num_class) logits (args.old_sp=True).

    Computes in x.dtype (feed bf16 to halve the dominant HBM read of x); all
    matmuls accumulate in f32 and the pooling accumulator is f32.
    """
    N, I, C, T, V, M = x.shape
    cdt = x.dtype
    # Free layout: adjacent-dim merge only (no transpose, no HBM copy).
    # Features (i, c) land on the sublane axis; all (t, v, m) locations are
    # lane-dense on the last axis.
    x_f = x.reshape(N, I * C, T * V * M)

    # Input streams fused into one block-diagonal matmul (== channel concat);
    # all weights transposed so the location axis stays lane-dense in-kernel.
    w_in_t = block_diag(*params["w_in"]).T.astype(cdt)          # (I*H, I*C)
    b_in = jnp.concatenate(params["b_in"]).astype(jnp.float32).reshape(-1, 1)
    w_main_t = params["w_main"].T.astype(cdt)                   # (Cm, I*H)
    b_main = params["b_main"].astype(jnp.float32).reshape(-1, 1)
    w_cls_t = params["w_cls"].T.astype(cdt)                     # (nc, Cm)
    b_cls = params["b_cls"].astype(jnp.float32).reshape(-1, 1)

    return _fused_forward(x_f, w_in_t, b_in, w_main_t, b_main, w_cls_t, b_cls,
                          tile_budget)


def student_forward_ref(x, params):
    """Pure-jnp reference (mirrors the original multi-stream torch structure)."""
    N, I, C, T, V, M = x.shape
    x = jnp.transpose(x, (1, 0, 5, 2, 3, 4)).reshape(I, N * M, C, T, V)
    feats = []
    for i in range(I):
        xi = jnp.transpose(x[i], (0, 2, 3, 1)).reshape(-1, C)
        feats.append(jnp.maximum(xi @ params["w_in"][i] + params["b_in"][i], 0.0))
    feat = jnp.concatenate(feats, axis=1)
    main = jnp.maximum(feat @ params["w_main"] + params["b_main"], 0.0)
    Cm = main.shape[1]
    pooled = main.reshape(N, M * T * V, Cm).mean(axis=1)
    return pooled @ params["w_cls"] + params["b_cls"]


# ------------------------------ parameter init --------------------------------

def init_params(key, C, H, Cm, num_class, num_input):
    ks = jax.random.split(key, num_input + 2)
    params = {}
    # InputStream / MainStream convs: kaiming_normal(fan_out, leaky_relu), bias 0.
    gain = (2.0 / (1.0 + 0.01 ** 2)) ** 0.5
    params["w_in"] = [
        (gain / (H ** 0.5)) * jax.random.normal(ks[i], (C, H), jnp.float32)
        for i in range(num_input)
    ]
    params["b_in"] = [jnp.zeros((H,), jnp.float32) for _ in range(num_input)]
    params["w_main"] = (gain / (Cm ** 0.5)) * jax.random.normal(
        ks[num_input], (num_input * H, Cm), jnp.float32
    )
    params["b_main"] = jnp.zeros((Cm,), jnp.float32)
    # Classifier Linear: normal(std=0.001), bias 0.
    params["w_cls"] = 0.001 * jax.random.normal(
        ks[num_input + 1], (Cm, num_class), jnp.float32
    )
    params["b_cls"] = jnp.zeros((num_class,), jnp.float32)
    return params


# ----------------------------------- main --------------------------------------

if __name__ == "__main__":
    # N samples, I=4 modalities (J,V,B,A), C channels, T timesteps, V joints,
    # M skeletons.  (Real model dims H/Cm would ideally be multiples of 128 for
    # MXU width; the demo keeps the module's small dims.)
    N, I, C, T, V, M = 2, 4, 6, 8, 16, 2
    H, Cm, NUM_CLASS = 16, 32, 10

    key = jax.random.PRNGKey(0)
    k_x, k_p = jax.random.split(key)
    x = jax.random.normal(k_x, (N, I, C, T, V, M), jnp.float32)
    params = init_params(k_p, C, H, Cm, NUM_CLASS, I)

    ref = jax.block_until_ready(student_forward_ref(x, params))

    # f32, whole-sample location tiles (single accumulation step per sample).
    out = jax.block_until_ready(jax.jit(student_forward)(x, params))
    assert out.shape == (N, NUM_CLASS), out.shape
    assert jnp.allclose(out, ref, atol=1e-5, rtol=1e-4), "f32 mismatch"

    # f32, forced multi-tile path (exercises the VMEM pooling accumulator).
    fwd_tiled = jax.jit(
        functools.partial(student_forward, tile_budget=I * C * 128 * 4))
    out_tiled = jax.block_until_ready(fwd_tiled(x, params))
    assert jnp.allclose(out_tiled, ref, atol=1e-5, rtol=1e-4), "tiled mismatch"

    # bf16 activations/weights (f32 accumulation): halves the HBM read of x.
    out_bf16 = jax.block_until_ready(
        jax.jit(student_forward)(x.astype(jnp.bfloat16), params))
    assert jnp.allclose(out_bf16, ref, atol=2e-3, rtol=5e-2), "bf16 mismatch"

    print("KERNEL_OK")
</pallas_src>

<mosaic_0001>
module attributes {stable_mosaic.version = 11 : i64} {
  func.func @_student_kernel(%arg0: i32, %arg1: i32, %arg2: memref<1x24x256xf32, #tpu.memory_space<vmem>>, %arg3: memref<64x24xf32, #tpu.memory_space<vmem>>, %arg4: memref<64x1xf32, #tpu.memory_space<vmem>>, %arg5: memref<32x64xf32, #tpu.memory_space<vmem>>, %arg6: memref<32x1xf32, #tpu.memory_space<vmem>>, %arg7: memref<10x32xf32, #tpu.memory_space<vmem>>, %arg8: memref<10x1xf32, #tpu.memory_space<vmem>>, %arg9: memref<1x10x1xf32, #tpu.memory_space<vmem>>, %arg10: memref<32x1xf32, #tpu.memory_space<vmem>>) attributes {dimension_semantics = [#tpu.dimension_semantics<parallel>, #tpu.dimension_semantics<arbitrary>], iteration_bounds = array<i64: 2, 1>, scalar_prefetch = 0 : i64, scratch_operands = 1 : i64, tpu.core_type = #tpu.core_type<tc>, window_params = [{transform_indices = @transform_0, window_bounds = array<i64: 1, 24, 256>}, {pipeline_mode = #tpu.pipeline_mode<synchronous>, transform_indices = @transform_1, window_bounds = array<i64: 64, 24>}, {pipeline_mode = #tpu.pipeline_mode<synchronous>, transform_indices = @transform_2, window_bounds = array<i64: 64, 1>}, {pipeline_mode = #tpu.pipeline_mode<synchronous>, transform_indices = @transform_3, window_bounds = array<i64: 32, 64>}, {pipeline_mode = #tpu.pipeline_mode<synchronous>, transform_indices = @transform_4, window_bounds = array<i64: 32, 1>}, {pipeline_mode = #tpu.pipeline_mode<synchronous>, transform_indices = @transform_5, window_bounds = array<i64: 10, 32>}, {pipeline_mode = #tpu.pipeline_mode<synchronous>, transform_indices = @transform_6, window_bounds = array<i64: 10, 1>}, {transform_indices = @transform_7, window_bounds = array<i64: 1, 10, 1>}]} {
    %c0_i32 = arith.constant 0 : i32
    %0 = arith.cmpi eq, %arg1, %c0_i32 : i32
    %1 = arith.extui %0 : i1 to i32
    %c0_i32_0 = arith.constant 0 : i32
    %2 = arith.cmpi ne, %1, %c0_i32_0 : i32
    scf.if %2 {
      %cst_21 = arith.constant 0.000000e+00 : f32
      %27 = vector.broadcast %cst_21 : f32 to vector<32x1xf32>
      %c0_22 = arith.constant 0 : index
      %c0_23 = arith.constant 0 : index
      %28 = vector.load %arg10[%c0_22, %c0_23] : memref<32x1xf32, #tpu.memory_space<vmem>>, vector<32x1xf32>
      tpu.vector_store %arg10[%c0_22, %c0_23], %27 {strides = array<i32>} : memref<32x1xf32, #tpu.memory_space<vmem>>, vector<32x1xf32>,
    } else {
    }
    %c0 = arith.constant 0 : index
    %c0_1 = arith.constant 0 : index
    %c0_2 = arith.constant 0 : index
    %3 = vector.load %arg2[%c0, %c0_1, %c0_2] : memref<1x24x256xf32, #tpu.memory_space<vmem>>, vector<1x24x256xf32>
    %4 = vector.shape_cast %3 : vector<1x24x256xf32> to vector<24x256xf32>
    %c0_3 = arith.constant 0 : index
    %c0_4 = arith.constant 0 : index
    %5 = vector.load %arg3[%c0_3, %c0_4] : memref<64x24xf32, #tpu.memory_space<vmem>>, vector<64x24xf32>
    %cst = arith.constant dense<0.000000e+00> : vector<64x256xf32>
    %6 = tpu.matmul %5, %4, %cst {dimension_numbers = #tpu.dot_dimension_numbers<[1], [0], [0], [1], [0, 0, 1, 1], [], []>} : vector<64x24xf32>, vector<24x256xf32>, vector<64x256xf32> -> vector<64x256xf32>
    %c0_5 = arith.constant 0 : index
    %c0_6 = arith.constant 0 : index
    %7 = vector.load %arg4[%c0_5, %c0_6] : memref<64x1xf32, #tpu.memory_space<vmem>>, vector<64x1xf32>
    %8 = vector.broadcast %7 : vector<64x1xf32> to vector<64x256xf32>
    %9 = arith.addf %6, %8 : vector<64x256xf32>
    %cst_7 = arith.constant 0.000000e+00 : f32
    %10 = vector.broadcast %cst_7 : f32 to vector<64x256xf32>
    %11 = arith.maximumf %9, %10 : vector<64x256xf32>
    %c0_8 = arith.constant 0 : index
    %c0_9 = arith.constant 0 : index
    %12 = vector.load %arg5[%c0_8, %c0_9] : memref<32x64xf32, #tpu.memory_space<vmem>>, vector<32x64xf32>
    %cst_10 = arith.constant dense<0.000000e+00> : vector<32x256xf32>
    %13 = tpu.matmul %12, %11, %cst_10 {dimension_numbers = #tpu.dot_dimension_numbers<[1], [0], [0], [1], [0, 0, 1, 1], [], []>} : vector<32x64xf32>, vector<64x256xf32>, vector<32x256xf32> -> vector<32x256xf32>
    %c0_11 = arith.constant 0 : index
    %c0_12 = arith.constant 0 : index
    %14 = vector.load %arg6[%c0_11, %c0_12] : memref<32x1xf32, #tpu.memory_space<vmem>>, vector<32x1xf32>
    %15 = vector.broadcast %14 : vector<32x1xf32> to vector<32x256xf32>
    %16 = arith.addf %13, %15 : vector<32x256xf32>
    %cst_13 = arith.constant 0.000000e+00 : f32
    %17 = vector.broadcast %cst_13 : f32 to vector<32x256xf32>
    %18 = arith.maximumf %16, %17 : vector<32x256xf32>
    %c0_14 = arith.constant 0 : index
    %c0_15 = arith.constant 0 : index
    %19 = vector.load %arg10[%c0_14, %c0_15] : memref<32x1xf32, #tpu.memory_space<vmem>>, vector<32x1xf32>
    %cst_16 = arith.constant dense<0.000000e+00> : vector<32xf32>
    %20 = vector.multi_reduction <add>, %18, %cst_16 [1] : vector<32x256xf32> to vector<32xf32>
    %21 = vector.shape_cast %20 : vector<32xf32> to vector<32x1xf32>
    %22 = arith.addf %19, %21 : vector<32x1xf32>
    %c0_17 = arith.constant 0 : index
    %c0_18 = arith.constant 0 : index
    %23 = vector.load %arg10[%c0_17, %c0_18] : memref<32x1xf32, #tpu.memory_space<vmem>>, vector<32x1xf32>
    tpu.vector_store %arg10[%c0_17, %c0_18], %22 {strides = array<i32>} : memref<32x1xf32, #tpu.memory_space<vmem>>, vector<32x1xf32>,
    %c0_i32_19 = arith.constant 0 : i32
    %24 = arith.cmpi eq, %arg1, %c0_i32_19 : i32
    %25 = arith.extui %24 : i1 to i32
    %c0_i32_20 = arith.constant 0 : i32
    %26 = arith.cmpi ne, %25, %c0_i32_20 : i32
    scf.if %26 {
      %c0_21 = arith.constant 0 : index
      %c0_22 = arith.constant 0 : index
      %27 = vector.load %arg10[%c0_21, %c0_22] : memref<32x1xf32, #tpu.memory_space<vmem>>, vector<32x1xf32>
      %cst_23 = arith.constant 3.906250e-03 : f32
      %28 = vector.broadcast %cst_23 : f32 to vector<32x1xf32>
      %29 = arith.mulf %27, %28 : vector<32x1xf32>
      %c0_24 = arith.constant 0 : index
      %c0_25 = arith.constant 0 : index
      %30 = vector.load %arg7[%c0_24, %c0_25] : memref<10x32xf32, #tpu.memory_space<vmem>>, vector<10x32xf32>
      %cst_26 = arith.constant dense<0.000000e+00> : vector<10x1xf32>
      %31 = tpu.matmul %30, %29, %cst_26 {dimension_numbers = #tpu.dot_dimension_numbers<[1], [0], [0], [1], [0, 0, 1, 1], [], []>} : vector<10x32xf32>, vector<32x1xf32>, vector<10x1xf32> -> vector<10x1xf32>
      %c0_27 = arith.constant 0 : index
      %c0_28 = arith.constant 0 : index
      %32 = vector.load %arg8[%c0_27, %c0_28] : memref<10x1xf32, #tpu.memory_space<vmem>>, vector<10x1xf32>
      %33 = arith.addf %31, %32 : vector<10x1xf32>
      %c0_29 = arith.constant 0 : index
      %c0_30 = arith.constant 0 : index
      %c0_31 = arith.constant 0 : index
      %34 = vector.load %arg9[%c0_29, %c0_30, %c0_31] : memref<1x10x1xf32, #tpu.memory_space<vmem>>, vector<1x10x1xf32>
      %35 = vector.shape_cast %34 : vector<1x10x1xf32> to vector<10x1xf32>
      %36 = vector.shape_cast %33 : vector<10x1xf32> to vector<1x10x1xf32>
      tpu.vector_store %arg9[%c0_29, %c0_30, %c0_31], %36 {strides = array<i32>} : memref<1x10x1xf32, #tpu.memory_space<vmem>>, vector<1x10x1xf32>,
    } else {
    }
    return
  }
  func.func @transform_0(%arg0: i32, %arg1: i32) -> (i32, i32, i32) {
    %c0_i32 = arith.constant 0 : i32
    %c0_i32_0 = arith.constant 0 : i32
    return %arg0, %c0_i32, %arg1 : i32, i32, i32
  }
  func.func @transform_1(%arg0: i32, %arg1: i32) -> (i32, i32) {
    %c0_i32 = arith.constant 0 : i32
    %c0_i32_0 = arith.constant 0 : i32
    %c0_i32_1 = arith.constant 0 : i32
    return %c0_i32, %c0_i32_0 : i32, i32
  }
  func.func @transform_2(%arg0: i32, %arg1: i32) -> (i32, i32) {
    %c0_i32 = arith.constant 0 : i32
    %c0_i32_0 = arith.constant 0 : i32
    %c0_i32_1 = arith.constant 0 : i32
    return %c0_i32, %c0_i32_0 : i32, i32
  }
  func.func @transform_3(%arg0: i32, %arg1: i32) -> (i32, i32) {
    %c0_i32 = arith.constant 0 : i32
    %c0_i32_0 = arith.constant 0 : i32
    %c0_i32_1 = arith.constant 0 : i32
    return %c0_i32, %c0_i32_0 : i32, i32
  }
  func.func @transform_4(%arg0: i32, %arg1: i32) -> (i32, i32) {
    %c0_i32 = arith.constant 0 : i32
    %c0_i32_0 = arith.constant 0 : i32
    %c0_i32_1 = arith.constant 0 : i32
    return %c0_i32, %c0_i32_0 : i32, i32
  }
  func.func @transform_5(%arg0: i32, %arg1: i32) -> (i32, i32) {
    %c0_i32 = arith.constant 0 : i32
    %c0_i32_0 = arith.constant 0 : i32
    %c0_i32_1 = arith.constant 0 : i32
    return %c0_i32, %c0_i32_0 : i32, i32
  }
  func.func @transform_6(%arg0: i32, %arg1: i32) -> (i32, i32) {
    %c0_i32 = arith.constant 0 : i32
    %c0_i32_0 = arith.constant 0 : i32
    %c0_i32_1 = arith.constant 0 : i32
    return %c0_i32, %c0_i32_0 : i32, i32
  }
  func.func @transform_7(%arg0: i32, %arg1: i32) -> (i32, i32, i32) {
    %c0_i32 = arith.constant 0 : i32
    %c0_i32_0 = arith.constant 0 : i32
    %c0_i32_1 = arith.constant 0 : i32
    return %arg0, %c0_i32, %c0_i32_0 : i32, i32, i32
  }
}

</mosaic_0001>

<bundles_post_ra>
// kernel: student_forward.1
= control target key start
LH: loop header
LB: loop body
LE: loop exit
PB: predicated region body
PF: predicated region fallthrough
CT: control target
= control target key end

     0   :  { %s1001_s24 = smov 0   ;;  %s1003_s25 = smov 0   ;;  %s1157_s0 = inlined_call_operand.vmem [shape: f32[2,24,256], index: 0, kind: input, shape index: {}]   ;;  %s1158_s1 = inlined_call_operand.vmem [shape: f32[64,24], index: 1, kind: input, shape index: {}]   ;;  %s1159_s2 = inlined_call_operand.vmem [shape: f32[64,1], index: 2, kind: input, shape index: {}]   ;;  %s1160_s3 = inlined_call_operand.vmem [shape: f32[32,64], index: 3, kind: input, shape index: {}]   ;;  %s1161_s4 = inlined_call_operand.vmem [shape: f32[32,1], index: 4, kind: input, shape index: {}]   ;;  %s1162_s5 = inlined_call_operand.vmem [shape: f32[10,32], index: 5, kind: input, shape index: {}]   ;;  %s1163_s6 = inlined_call_operand.vmem [shape: f32[10,1], index: 6, kind: input, shape index: {}]   ;;  %s1164_s7 = inlined_call_operand.vmem [shape: f32[2,10,1], index: 7, kind: output, shape index: {}]  }
   0x1   :  { %s1005_s26 = smov 0  }
   0x2 LB: > { %s29_s27 = sadd.s32 1, %s953_s25  ;;  %p868_p0 = scmp.ge.s32.totalorder %s957_s26, 1  ;;  %s957_s26 = sphi %s1005_s26, %s17_s26   ;;  %s953_s25 = sphi %s1003_s25, %s1166_s25   ;;  %s949_s24 = sphi %s1001_s24, %s1165_s24  }
   0x3   : > { %p31_p1 = scmp.ge.s32.totalorder %s29_s27, 2  ;;  %p256_p2 = scmp.lt.s32.totalorder %s957_s26, 3 }
   0x5   : > { %s1168_s27 = smov (%p31_p1, %s29_s27), 0  ;;  %p257_p3 = pnand %p868_p0, %p256_p2 }
   0x6   : > { %p293_p4 = scmp.lt.s32.totalorder (!%p257_p3), %s949_s24, 1 }
   0x7   : > { %260 = sbr.rel (%p257_p3) target bundleno = 839 (0x347), region = 48 }
   0xc   : > { %v959_v0 = vmov 0.0   ;;  %s1170_s24 = smov (!%p293_p4, %s949_s24), 1  ;;  %v960_v1 = vmov 0   ;;  %v335_v2 = vld [vmem:[%s1159_s2 + $0x28] sm:$0xff]  ;;  %v337_v3 = vld [vmem:[%s1159_s2 + $0x38] sm:$0xff]  ;;  %v334_v4 = vld [vmem:[%s1159_s2 + $0x20] sm:$0xff] }
   0xd   : > { %467 = vmatprep.mubr.f32.mxu0 %v959_v0  ;;  %637 = vmatprep.mubr.f32.mxu1 %v959_v0  ;;  %s906_s9 = smul.u32 48, %s1170_s24  ;;  %v336_v5 = vld [vmem:[%s1159_s2 + $0x30] sm:$0xff]  ;;  %v333_v12 = vld [vmem:[%s1159_s2 + $0x18] sm:$0xff]  ;;  %v322_v14 = vld [vmem:[%s1158_s1] sm:$0xff]  ;;  %vm378_vm0 = vcmask 195584   ;;  %vm560_vm1 = vcmask 523264  }
   0xe   : > { %934 = vset.pattern.permute.xlu1 %v960_v1  ;;  %933 = vset.pattern.permute.xlu0 %v960_v1  ;;  %v332_v10 = vld [vmem:[%s1159_s2 + $0x10] sm:$0xff]  ;;  %v330_v15 = vld [vmem:[%s1159_s2] sm:$0xff]  ;;  %v331_v16 = vld [vmem:[%s1159_s2 + $0x8] sm:$0xff]  ;;  %vm311_vm2 = vcmask 7168   ;;  %vm710_vm3 = vcmask 261120   ;;  %s888_s23 = sshll.u32 %s1170_s24, 4 }
   0xf   : > { %365 = vperm.xlu1 %934, %v335_v2   ;;  %375 = vperm.xlu0 %933, %v337_v3   ;;  %s300_s16 = scalar_lea.vmem %s1157_s0, %s906_s9  ;;  %v323_v17 = vld [vmem:[%s1158_s1 + $0x8] sm:$0xff]  ;;  %v538_v18 = vld [vmem:[%s1161_s4 + $0x10] sm:$0xff]  ;;  %v539_v19 = vld [vmem:[%s1161_s4 + $0x18] sm:$0xff]  ;;  %314 = vst.msk [vmem:[#allocation2 + $0x10] sm:$0xff] %vm311_vm2, %v959_v0  ;;  %s306_s9 = scalar_lea.vmem %s1164_s7, %s888_s23  ;;  %vm793_vm4 = vcmask 1024  }
  0x10   : > { %v321_v6 = vld [vmem:[%s300_s16 + $0x28] sm:$0xff]  ;;  %v320_v7 = vld [vmem:[%s300_s16 + $0x20] sm:$0xff]  ;;  %v319_v8 = vld [vmem:[%s300_s16 + $0x18] sm:$0xff]  ;;  %312 = vst.msk [vmem:[#allocation2] sm:$0xff] %vm311_vm2, %v959_v0 }
  0x11   : > { %429 = vmatprep.subr.mxu0 %v321_v6  ;;  %v318_v9 = vld [vmem:[%s300_s16 + $0x10] sm:$0xff]  ;;  %v317_v11 = vld [vmem:[%s300_s16 + $0x8] sm:$0xff]  ;;  %v316_v13 = vld [vmem:[%s300_s16] sm:$0xff]  ;;  %313 = vst.msk [vmem:[#allocation2 + $0x8] sm:$0xff] %vm311_vm2, %v959_v0 }
  0x12   : > { %430 = vmatpush1.msra.mxu0 %v320_v7  ;;  %v324_v20 = vld [vmem:[%s1158_s1 + $0x10] sm:$0xff]  ;;  %v536_v21 = vld [vmem:[%s1161_s4] sm:$0xff]  ;;  %v537_v22 = vld [vmem:[%s1161_s4 + $0x8] sm:$0xff]  ;;  %315 = vst.msk [vmem:[#allocation2 + $0x18] sm:$0xff] %vm311_vm2, %v959_v0 }
  0x13   : > { %360 = vperm.xlu1 %934, %v334_v4   ;;  %370 = vperm.xlu0 %933, %v336_v5   ;;  %v325_v23 = vld [vmem:[%s1158_s1 + $0x18] sm:$0xff]  ;;  %v326_v24 = vld [vmem:[%s1158_s1 + $0x20] sm:$0xff]  ;;  %v327_v25 = vld [vmem:[%s1158_s1 + $0x28] sm:$0xff] }
  0x14   : > { %431 = vmatprep.subr.mxu0 %v319_v8  ;;  %v328_v26 = vld [vmem:[%s1158_s1 + $0x30] sm:$0xff]  ;;  %v329_v27 = vld [vmem:[%s1158_s1 + $0x38] sm:$0xff] }
  0x15   : > { %432 = vmatpush1.msra.mxu0 %v318_v9 }
  0x16   : > { %433 = vmatprep.subr.mxu0 %v317_v11 }
  0x17   : > { %350 = vperm.xlu1 %934, %v332_v10   ;;  %355 = vperm.xlu0 %933, %v333_v12  }
  0x18   : > { %434 = vmatpush1.msra.mxu0 %v316_v13 }
  0x19   : > { %872 = vmatmul.mubr.msk.f32.vlgmr.msra.gmra.mxu0 %vm378_vm0, %v322_v14 }
  0x1a   : > { %473 = vmatprep.mubr.f32.mxu0 %v959_v0 }
  0x1b   : > { %340 = vperm.xlu1 %934, %v330_v15   ;;  %345 = vperm.xlu0 %933, %v331_v16  }
  0x1d   : > { %873 = vmatmul.mubr.msk.f32.gmra.mxu0 %vm378_vm0, %v323_v17 }
  0x1e   : > { %479 = vmatprep.mubr.f32.mxu0 %v959_v0 }
  0x1f   : > { %552 = vperm.xlu1 %934, %v538_v18   ;;  %557 = vperm.xlu0 %933, %v539_v19  }
  0x21   : > { %874 = vmatmul.mubr.msk.f32.gmra.mxu0 %vm378_vm0, %v324_v20 }
  0x22   : > { %485 = vmatprep.mubr.f32.mxu0 %v959_v0 }
  0x23   : > { %542 = vperm.xlu1 %934, %v536_v21   ;;  %547 = vperm.xlu0 %933, %v537_v22   ;;  %v532_v21 = vld [vmem:[%s1160_s3] sm:$0xff]  ;;  %v533_v22 = vld [vmem:[%s1160_s3 + $0x8] sm:$0xff] }
  0x25   : > { %875 = vmatmul.mubr.msk.f32.gmra.mxu0 %vm378_vm0, %v325_v23  ;;  %v534_v23 = vld [vmem:[%s1160_s3 + $0x10] sm:$0xff] }
  0x26   : > { %491 = vmatprep.mubr.f32.mxu0 %v959_v0 }
  0x29   : > { %876 = vmatmul.mubr.msk.f32.gmra.mxu0 %vm378_vm0, %v326_v24  ;;  %v535_v24 = vld [vmem:[%s1160_s3 + $0x18] sm:$0xff] }
  0x2a   : > { %497 = vmatprep.mubr.f32.mxu0 %v959_v0 }
  0x2d   : > { %877 = vmatmul.mubr.msk.f32.gmra.mxu0 %vm378_vm0, %v327_v25 }
  0x2e   : > { %503 = vmatprep.mubr.f32.mxu0 %v959_v0 }
  0x31   : > { %878 = vmatmul.mubr.msk.f32.gmra.mxu0 %vm378_vm0, %v328_v26 }
  0x32   : > { %509 = vmatprep.mubr.f32.mxu0 %v959_v0 }
  0x35   : > { %879 = vmatmul.mubr.msk.f32.gmra.mxu0 %vm378_vm0, %v329_v27 }
  0x8a   : > { %v376_v39 = vpop.permute.xlu0 %375  ;;  %v366_v41 = vpop.permute.xlu1 %365 }
  0x8e   : > { %v371_v44 = vpop.permute.xlu0 %370  ;;  %v361_v46 = vpop.permute.xlu1 %360 }
  0x92   : > { %v356_v52 = vpop.permute.xlu0 %355  ;;  %v351_v57 = vpop.permute.xlu1 %350 }
  0x96   : > { %v346_v3 = vpop.permute.xlu0 %345  ;;  %v341_v8 = vpop.permute.xlu1 %340 }
  0xd9   : > { %v469_v28 = vpop.f32.mrf.mxu0 }
  0xda   : > { %v470_v15 = vadd.f32 %v469_v28, %v341_v8 }
  0xdb   : > { %v471_v29 = vpop.f32.mrf.mxu0 }
  0xdc   : > { %v472_v13 = vadd.f32 %v471_v29, %v341_v8  ;;  %v516_v20 = vmax.f32 %v470_v15, 0.0  ;;  %v553_v29 = vpop.permute.xlu1 %552  ;;  %v709_v15 = vld [vmem:[%s1163_s6 + $0x8] sm:$0x3] }
  0xdd   : > { %v475_v30 = vpop.f32.mrf.mxu0 }
  0xde   : > { %v476_v11 = vadd.f32 %v475_v30, %v346_v3  ;;  %v517_v19 = vmax.f32 %v472_v13, 0.0  ;;  %v558_v30 = vpop.permute.xlu0 %557 }
  0xdf   : > { %v477_v31 = vpop.f32.mrf.mxu0 }
  0xe0   : > { %v478_v9 = vadd.f32 %v477_v31, %v346_v3  ;;  %v518_v18 = vmax.f32 %v476_v11, 0.0  ;;  %v670_v3 = vld [vmem:[#allocation2] sm:$0xff] }
  0xe1   : > { %v481_v32 = vpop.f32.mrf.mxu0 }
  0xe2   : > { %v482_v6 = vadd.f32 %v481_v32, %v351_v57  ;;  %v519_v17 = vmax.f32 %v478_v9, 0.0 }
  0xe3   : > { %v483_v33 = vpop.f32.mrf.mxu0 }
  0xe4   : > { %v484_v4 = vadd.f32 %v483_v33, %v351_v57  ;;  %v520_v16 = vmax.f32 %v482_v6, 0.0  ;;  %v672_v57 = vld [vmem:[#allocation2 + $0x10] sm:$0xff] }
  0xe5   : > { %v487_v34 = vpop.f32.mrf.mxu0 }
  0xe6   : > { %v488_v1 = vadd.f32 %v487_v34, %v356_v52  ;;  %v521_v14 = vmax.f32 %v484_v4, 0.0 }
  0xe7   : > { %v489_v35 = vpop.f32.mrf.mxu0 }
  0xe8   : > { %v490_v62 = vadd.f32 %v489_v35, %v356_v52  ;;  %v522_v12 = vmax.f32 %v488_v1, 0.0 }
  0xe9   : > { %v493_v36 = vpop.f32.mrf.mxu0 }
  0xea   : > { %v494_v60 = vadd.f32 %v493_v36, %v361_v46  ;;  %v523_v10 = vmax.f32 %v490_v62, 0.0 }
  0xeb   : > { %v495_v37 = vpop.f32.mrf.mxu0 }
  0xec   : > { %v496_v58 = vadd.f32 %v495_v37, %v361_v46  ;;  %v524_v7 = vmax.f32 %v494_v60, 0.0  ;;  %v543_v46 = vpop.permute.xlu1 %542  ;;  %v673_v60 = vld [vmem:[#allocation2 + $0x18] sm:$0xff] }
  0xed   : > { %v499_v38 = vpop.f32.mrf.mxu0 }
  0xee   : > { %v500_v55 = vadd.f32 %v499_v38, %v366_v41  ;;  %v525_v5 = vmax.f32 %v496_v58, 0.0 }
  0xef   : > { %v501_v40 = vpop.f32.mrf.mxu0 }
  0xf0   : > { %v502_v53 = vadd.f32 %v501_v40, %v366_v41  ;;  %v526_v2 = vmax.f32 %v500_v55, 0.0 }
  0xf1   : > { %v505_v42 = vpop.f32.mrf.mxu0 }
  0xf2   : > { %v506_v51 = vadd.f32 %v505_v42, %v371_v44  ;;  %v527_v63 = vmax.f32 %v502_v53, 0.0 }
  0xf3   : > { %v507_v43 = vpop.f32.mrf.mxu0 }
  0xf4   : > { %v508_v49 = vadd.f32 %v507_v43, %v371_v44  ;;  %v528_v61 = vmax.f32 %v506_v51, 0.0 }
  0xf5   : > { %v511_v45 = vpop.f32.mrf.mxu0 }
  0xf6   : > { %v512_v47 = vadd.f32 %v511_v45, %v376_v39  ;;  %v529_v59 = vmax.f32 %v508_v49, 0.0 }
  0xf7   : > { %v513_v48 = vpop.f32.mrf.mxu0 }
  0xf8   : > { %v514_v50 = vadd.f32 %v513_v48, %v376_v39  ;;  %v530_v56 = vmax.f32 %v512_v47, 0.0  ;;  %v548_v39 = vpop.permute.xlu0 %547 }
  0xfa   : > { %v531_v54 = vmax.f32 %v514_v50, 0.0 }
  0xfc   : > { %589 = vmatprep.subr.mxu1 %v531_v54 }
  0xfd   : > { %590 = vmatpush1.msra.mxu1 %v530_v56  ;;  %v706_v56 = vld [vmem:[%s1162_s5] sm:$0xff] }
  0xfe   : > { %591 = vmatprep.subr.mxu1 %v529_v59 }
  0xff   : > { %592 = vmatpush1.msra.mxu1 %v528_v61 }
 0x100   : > { %593 = vmatprep.subr.mxu1 %v527_v63  ;;  %v671_v63 = vld [vmem:[#allocation2 + $0x8] sm:$0xff] }
 0x101   : > { %594 = vmatpush1.msra.mxu1 %v526_v2 }
 0x102   : > { %595 = vmatprep.subr.mxu1 %v525_v5 }
 0x103   : > { %596 = vmatpush1.msra.mxu1 %v524_v7 }
 0x104   : > { %597 = vmatprep.subr.mxu1 %v523_v10 }
 0x105   : > { %598 = vmatpush1.msra.mxu1 %v522_v12 }
 0x106   : > { %599 = vmatprep.subr.mxu1 %v521_v14  ;;  %v707_v14 = vld [vmem:[%s1162_s5 + $0x8] sm:$0x3] }
 0x107   : > { %600 = vmatpush1.msra.mxu1 %v520_v16 }
 0x108   : > { %601 = vmatprep.subr.mxu1 %v519_v17  ;;  %v708_v17 = vld [vmem:[%s1163_s6] sm:$0xff] }
 0x109   : > { %602 = vmatpush1.msra.mxu1 %v518_v18 }
 0x10a   : > { %603 = vmatprep.subr.mxu1 %v517_v19 }
 0x10b   : > { %604 = vmatpush1.msra.mxu1 %v516_v20 }
 0x10c   : > { %880 = vmatmul.mubr.msk.f32.vlgmr.msra.gmra.mxu1 %vm560_vm1, %v532_v21 }
 0x10d   : > { %643 = vmatprep.mubr.f32.mxu1 %v959_v0 }
 0x110   : > { %881 = vmatmul.mubr.msk.f32.gmra.mxu1 %vm560_vm1, %v533_v22 }
 0x111   : > { %649 = vmatprep.mubr.f32.mxu1 %v959_v0 }
 0x114   : > { %882 = vmatmul.mubr.msk.f32.gmra.mxu1 %vm560_vm1, %v534_v23 }
 0x115   : > { %655 = vmatprep.mubr.f32.mxu1 %v959_v0 }
 0x118   : > { %883 = vmatmul.mubr.msk.f32.gmra.mxu1 %vm560_vm1, %v535_v24 }
 0x119   : > { %903 = vmatprep.mubr.msk.f32.mxu1 %vm710_vm3, %v706_v56 }
 0x1cc   : > { %v639_v25 = vpop.f32.mrf.mxu1 }
 0x1cd   : > { %v640_v50 = vadd.f32 %v639_v25, %v543_v46 }
 0x1ce   : > { %v641_v26 = vpop.f32.mrf.mxu1 }
 0x1cf   : > { %v642_v47 = vadd.f32 %v641_v26, %v543_v46  ;;  %v662_v54 = vmax.f32 %v640_v50, 0.0 }
 0x1d0   : > { %v645_v27 = vpop.f32.mrf.mxu1 }
 0x1d1   : > { %v646_v0 = vadd.f32 %v645_v27, %v548_v39  ;;  %v663_v52 = vmax.f32 %v642_v47, 0.0 }
 0x1d2   : > { %v647_v28 = vpop.f32.mrf.mxu1 }
 0x1d3   : > { %v648_v41 = vadd.f32 %v647_v28, %v548_v39  ;;  %v664_v51 = vmax.f32 %v646_v0, 0.0  ;;  %v674_v55 = vadd.f32 %v663_v52, %v662_v54 }
 0x1d4   : > { %v651_v31 = vpop.f32.mrf.mxu1 }
 0x1d5   : > { %v652_v32 = vadd.f32 %v651_v31, %v553_v29  ;;  %v665_v48 = vmax.f32 %v648_v41, 0.0 }
 0x1d6   : > { %v653_v33 = vpop.f32.mrf.mxu1 }
 0x1d7   : > { %v654_v34 = vadd.f32 %v653_v33, %v553_v29  ;;  %v666_v36 = vmax.f32 %v652_v32, 0.0  ;;  %v677_v53 = vadd.f32 %v665_v48, %v664_v51 }
 0x1d8   : > { %v657_v35 = vpop.f32.mrf.mxu1 }
 0x1d9   : > { %v667_v37 = vmax.f32 %v654_v34, 0.0  ;;  %v658_v38 = vadd.f32 %v657_v35, %v558_v30 }
 0x1da   : > { %v659_v40 = vpop.f32.mrf.mxu1 }
 0x1db   : > { %v660_v42 = vadd.f32 %v659_v40, %v558_v30  ;;  %v680_v43 = vadd.f32 %v667_v37, %v666_v36  ;;  %v668_v44 = vmax.f32 %v658_v38, 0.0 }
 0x1dd   : > { %v669_v45 = vmax.f32 %v660_v42, 0.0  ;;  %681 = vadd.xlane.f32.xlu1 %v680_v43 }
 0x1df   : > { %v683_v49 = vadd.f32 %v669_v45, %v668_v44 }
 0x1e1   : > { %684 = vadd.xlane.f32.xlu0 %v683_v49 }
 0x1e5   : > { %678 = vadd.xlane.f32.xlu0 %v677_v53 }
 0x1e9   : > { %675 = vadd.xlane.f32.xlu0 %v674_v55 }
 0x266   : > { %v682_v58 = vpop.xlane.xlu1 %681 }
 0x267   : > { %v688_v59 = vadd.f32 %v682_v58, %v672_v57 }
 0x269   : > { %693 = vst.msk [vmem:[#allocation2 + $0x10] sm:$0xff] %vm311_vm2, %v688_v59 }
 0x26a   : > { %v685_v61 = vpop.xlane.xlu0 %684 }
 0x26b   : > { %v689_v62 = vadd.f32 %v685_v61, %v673_v60 }
 0x26d   : > { %694 = vst.msk [vmem:[#allocation2 + $0x18] sm:$0xff] %vm311_vm2, %v689_v62 }
 0x26e   : > { %v679_v1 = vpop.xlane.xlu0 %678 }
 0x26f   : > { %v687_v2 = vadd.f32 %v679_v1, %v671_v63 }
 0x270   : > { %v700_v7 = vld [vmem:[#allocation2 + $0x10] sm:$0xff] }
 0x271   : > { %692 = vst.msk [vmem:[#allocation2 + $0x8] sm:$0xff] %vm311_vm2, %v687_v2  ;;  %v704_v9 = vmul.f32 0.00390625, %v700_v7 }
 0x272   : > { %v676_v4 = vpop.xlane.xlu0 %675 }
 0x273   : > { %v686_v5 = vadd.f32 %v676_v4, %v670_v3 }
 0x274   : > { %v701_v6 = vld [vmem:[#allocation2 + $0x18] sm:$0xff] }
 0x275   : > { %691 = vst.msk [vmem:[#allocation2] sm:$0xff] %vm311_vm2, %v686_v5  ;;  %v705_v8 = vmul.f32 0.00390625, %v701_v6 }
 0x277   : > { %895 = vmatprep.subr.mxu1 %v705_v8 }
 0x278   : > { %896 = vmatpush3.msra.mxu1 %v705_v8  ;;  %v699_v10 = vld [vmem:[#allocation2 + $0x8] sm:$0xff] }
 0x279   : > { %897 = vmatprep.subr.mxu1 %v704_v9  ;;  %v703_v11 = vmul.f32 0.00390625, %v699_v10 }
 0x27a   : > { %898 = vmatpush3.msra.mxu1 %v704_v9 }
 0x27b   : > { %899 = vmatprep.subr.mxu1 %v703_v11 }
 0x27c   : > { %900 = vmatpush3.msra.mxu1 %v703_v11  ;;  %v698_v12 = vld [vmem:[#allocation2] sm:$0xff] }
 0x27d   : > { %v702_v13 = vmul.f32 0.00390625, %v698_v12 }
 0x27f   : > { %901 = vmatprep.subr.mxu1 %v702_v13 }
 0x280   : > { %902 = vmatpush3.msra.mxu1 %v702_v13 }
 0x281   : > { %904 = vmatmul.mubr.msk.f32.vlgmr.msra.gmra.mxu1 %vm710_vm3, %v707_v14 }
 0x341   : > { %v905_v16 = vpop.f32.mrf.mxu1 }
 0x342   : > { %v789_v18 = vadd.f32 %v905_v16, %v709_v15 }
 0x343   : > { %v783_v19 = vpop.f32.mrf.mxu1 }
 0x344   : > { %794 = vst.msk [vmem:[%s306_s9 + $0x8] sm:$0x3] %vm793_vm4, %v789_v18  ;;  %v784_v20 = vadd.f32 %v783_v19, %v708_v17 }
 0x346   : > { %792 = vst.msk [vmem:[%s306_s9] sm:$0xff] %vm311_vm2, %v784_v20 }
 0x347 PF: > { %s17_s26 = sadd.s32 1, %s957_s26   ;;  %s1165_s24 = smov %s953_s25 }
 0x348   : > { %p14_p5 = scmp.ge.s32.totalorder %s17_s26, 4   ;;  %s1166_s25 = smov %s1168_s27 }
 0x34a   :  { %16 = sbr.rel (!%p14_p5) target bundleno = 2 (0x2), region = 86 }

</bundles_post_ra>
